<compile_context>
chip_gen: v5e
topology: v5e:2x2
jax: 0.10.0
libtpu: 0.0.40
codegen_flags: <defaults>
</compile_context>

<pallas_src>
import functools

import jax
import jax.numpy as jnp
from jax.experimental import pallas as pl
from jax.experimental.pallas import tpu as pltpu

# ---- model / problem constants (small, synthetic) --------------------------
V = 128        # vocab size (lane axis)
D = 32         # decoder hidden dim
MAX_POS = 16   # max decoder positions
PAD, EOS, UNK = 1, 2, 3
NEG_INF = float("-inf")


# ---------------------------------------------------------------------------
# Pallas kernel 1 (prompt pass): lprobs = log_softmax((H @ W) / T)
# ---------------------------------------------------------------------------
def _prompt_lprobs_kernel(x_ref, w_ref, o_ref, *, inv_temp):
    logits = jnp.dot(x_ref[...], w_ref[...], preferred_element_type=jnp.float32)
    if inv_temp != 1.0:            # static: skip the VALU pass at temperature == 1.0
        logits = logits * inv_temp
    m = jnp.max(logits, axis=-1, keepdims=True)
    lse = jnp.log(jnp.sum(jnp.exp(logits - m), axis=-1, keepdims=True)) + m
    o_ref[...] = logits - lse


def prompt_lprobs(h, w, temperature, block_rows=1024):
    """h: [M, D] f32, w: [D, V] f32 -> log-probs [M, V] f32."""
    M = h.shape[0]
    inv_temp = (1.0 / temperature) if (temperature > 0 and temperature != 1.0) else 1.0
    m8 = ((M + 7) // 8) * 8
    tm = min(block_rows, m8)                       # whole prompt in one step when small
    m_pad = ((M + tm - 1) // tm) * tm
    if m_pad != M:
        h = jnp.pad(h, ((0, m_pad - M), (0, 0)))
    out = pl.pallas_call(
        functools.partial(_prompt_lprobs_kernel, inv_temp=float(inv_temp)),
        out_shape=jax.ShapeDtypeStruct((m_pad, V), jnp.float32),
        grid=(m_pad // tm,),
        in_specs=[
            pl.BlockSpec((tm, D), lambda i: (i, 0)),
            pl.BlockSpec((D, V), lambda i: (0, 0)),
        ],
        out_specs=pl.BlockSpec((tm, V), lambda i: (i, 0)),
        compiler_params=pltpu.CompilerParams(dimension_semantics=("parallel",)),
    )(h, w)
    return out[:M]


# ---------------------------------------------------------------------------
# Pallas kernel 2: the WHOLE decode loop in one launch.
# Per grid step s (absolute position step = start_step + s):
#   masking -> greedy max / first-argmax -> write token/score lane s ->
#   incremental next-step lprobs via the fused (embed @ w_out) table.
# ---------------------------------------------------------------------------
def _fused_decode_kernel(lp0_ref, table_ref, pos_ref, *refs,
                         n_rows, start_step, min_len, max_len,
                         pad_id, eos_id, stop_ids, inv_temp, need_logprobs):
    if need_logprobs:
        tok_ref, score_ref, dist_ref, lp_sc, eos_sc, tok_sc, score_sc = refs
    else:
        tok_ref, score_ref, lp_sc, eos_sc, tok_sc, score_sc = refs
        dist_ref = None

    s = pl.program_id(0)
    num_steps = pl.num_programs(0)
    step = s + start_step          # absolute decode position

    @pl.when(s == 0)
    def _init():
        lp_sc[...] = lp0_ref[...]
        row = jax.lax.broadcasted_iota(jnp.int32, eos_sc.shape, 0)
        eos_sc[...] = (row >= n_rows).astype(jnp.float32)   # padded rows start finished
        tok_sc[...] = jnp.full(tok_sc.shape, pad_id, jnp.int32)
        score_sc[...] = jnp.zeros(score_sc.shape, jnp.float32)

    lp = lp_sc[...]                                   # [n_pad, V] raw log-probs carry
    fin = eos_sc[...]                                 # [n_pad, 1], 1.0 == finished
    finished = fin > 0.5
    # reference's `if torch.all(eos_mask): break` -> masked no-op steps
    active = jnp.min(fin, axis=0, keepdims=True) < 0.5          # [1, 1]

    vocab = jax.lax.broadcasted_iota(jnp.int32, lp.shape, 1)

    # ---- vocab masking (mirrors the reference's in-place writes, same order) ----
    if min_len > start_step:       # static: min_len can never bite otherwise
        ban = vocab == eos_id
        for st in stop_ids:
            ban = jnp.logical_or(ban, vocab == st)
        lp = jnp.where(jnp.logical_and(ban, step < min_len), NEG_INF, lp)
    lp = jnp.where(jnp.isnan(lp), NEG_INF, lp)                   # NaN scrub
    lp = jnp.where(vocab == pad_id, NEG_INF, lp)                 # never emit pad
    not_eos = vocab != eos_id
    lp = jnp.where(jnp.logical_and(step >= max_len - 1, not_eos), NEG_INF, lp)
    lp = jnp.where(jnp.logical_and(finished, not_eos), NEG_INF, lp)

    # ---- greedy max + first-argmax over vocab (lprobs.max(dim=-1)) ----
    mval = jnp.max(lp, axis=-1, keepdims=True)                   # [n_pad, 1]
    cand = jnp.where(lp == mval, vocab.astype(jnp.float32), float(V))
    midx = jnp.min(cand, axis=-1, keepdims=True).astype(jnp.int32)   # [n_pad, 1]

    # ---- lane-dense accumulation: decode step s -> lane s of the slabs ----
    lane = jax.lax.broadcasted_iota(jnp.int32, tok_sc.shape, 1)  # [n_pad, 128]
    hit = jnp.logical_and(lane == s, active)
    tok_sc[...] = jnp.where(hit, jnp.broadcast_to(midx, tok_sc.shape), tok_sc[...])
    score_sc[...] = jnp.where(hit, jnp.broadcast_to(mval, score_sc.shape), score_sc[...])

    if need_logprobs:
        # per-step masked lprobs, streamed to HBM by the step-indexed BlockSpec
        dist_ref[...] = jnp.where(active, lp, 0.0).reshape(dist_ref.shape)

    # ---- eos / stop-token bookkeeping ----
    hit_stop = midx == eos_id
    for st in stop_ids:
        hit_stop = jnp.logical_or(hit_stop, midx == st)
    eos_sc[...] = jnp.maximum(fin, hit_stop.astype(jnp.float32))

    # ---- incremental next-step lprobs via the fused (embed @ w_out) table ----
    onehot = (vocab == midx).astype(jnp.float32)                 # [n_pad, V]
    logits = jnp.dot(onehot, table_ref[...], preferred_element_type=jnp.float32)
    logits = logits + pos_ref[...].reshape(1, V)                 # pos-logits row for `step`
    if inv_temp != 1.0:
        logits = logits * inv_temp
    m = jnp.max(logits, axis=-1, keepdims=True)
    lse = jnp.log(jnp.sum(jnp.exp(logits - m), axis=-1, keepdims=True)) + m
    lp_sc[...] = logits - lse

    # ---- single HBM flush of the token/score slabs at the last step ----
    @pl.when(s == num_steps - 1)
    def _flush():
        tok_ref[...] = tok_sc[...]
        score_ref[...] = score_sc[...]


def make_fused_decode(*, n_pad, num_steps, n_rows, start_step, min_len, max_len,
                      pad_id, eos_id, stop_ids, inv_temp, need_logprobs):
    assert num_steps <= 128, "token/score slabs map one decode step per lane"
    kernel = functools.partial(
        _fused_decode_kernel, n_rows=n_rows, start_step=start_step,
        min_len=min_len, max_len=max_len, pad_id=pad_id, eos_id=eos_id,
        stop_ids=tuple(stop_ids), inv_temp=float(inv_temp),
        need_logprobs=need_logprobs)
    const2 = lambda s: (0, 0)

    out_shape = [jax.ShapeDtypeStruct((n_pad, 128), jnp.int32),     # token slab
                 jax.ShapeDtypeStruct((n_pad, 128), jnp.float32)]   # score slab
    out_specs = [pl.BlockSpec((n_pad, 128), const2),
                 pl.BlockSpec((n_pad, 128), const2)]
    if need_logprobs:
        # streamed per step (leading step dim keeps the last two block dims full)
        out_shape.append(jax.ShapeDtypeStruct((num_steps, n_pad, V), jnp.float32))
        out_specs.append(pl.BlockSpec((1, n_pad, V), lambda s: (s, 0, 0)))

    return pl.pallas_call(
        kernel,
        out_shape=tuple(out_shape),
        grid_spec=pltpu.PrefetchScalarGridSpec(
            num_scalar_prefetch=0,
            grid=(num_steps,),
            in_specs=[
                pl.BlockSpec((n_pad, V), const2),               # initial lprobs
                pl.BlockSpec((V, V), const2),                   # embed @ w_out (f32)
                pl.BlockSpec((1, 1, V), lambda s: (s, 0, 0)),   # pos @ w_out row for step
            ],
            out_specs=tuple(out_specs),
            scratch_shapes=[
                pltpu.VMEM((n_pad, V), jnp.float32),    # lprobs carry
                pltpu.VMEM((n_pad, 1), jnp.float32),    # finished-mask carry
                pltpu.VMEM((n_pad, 128), jnp.int32),    # token slab accumulator
                pltpu.VMEM((n_pad, 128), jnp.float32),  # score slab accumulator
            ],
        ),
        # Sequential carry across steps -> "arbitrary".  Deliberately no core split:
        # one step's masked tile is a single vreg at these sizes.
        compiler_params=pltpu.CompilerParams(dimension_semantics=("arbitrary",)),
    )


# ---------------------------------------------------------------------------
# Synthetic decoder model (deterministic weights)
# ---------------------------------------------------------------------------
class TinyDecoder:
    def __init__(self, key):
        k1, k2, k3 = jax.random.split(key, 3)
        self.embed = 0.1 * jax.random.normal(k1, (V, D), jnp.float32)
        self.pos = 0.1 * jax.random.normal(k2, (MAX_POS, D), jnp.float32)
        self.w_out = 0.1 * jax.random.normal(k3, (D, V), jnp.float32)

    def max_decoder_positions(self):
        return MAX_POS


# ---------------------------------------------------------------------------
# SequenceGenerator forward (_generate) — two Pallas launches per generation
# ---------------------------------------------------------------------------
class SequenceGeneratorPallas:
    def __init__(self, model, beam_size=1, max_len_a=0, max_len_b=200, min_len=1,
                 temperature=1.0, need_logprobs=False, stop=None, topp=-1):
        self.model = model
        self.pad, self.unk, self.eos = PAD, UNK, EOS
        self.vocab_size = V
        self.beam_size = min(beam_size, self.vocab_size - 1)
        self.max_len_a = max_len_a
        self.max_len_b = max_len_b
        self.min_len = min_len
        self.need_logprobs = need_logprobs
        self.stop = list(stop) if stop is not None else []
        if topp is None:
            topp = 0.0
        self.sampling_topp = max(0, topp)
        self.temperature = temperature
        assert temperature >= 0
        if not (self.temperature == 0.0 or self.sampling_topp == 0.0):
            # TODO(synk): top-p multinomial sampling (torch.multinomial) has no
            # deterministic Pallas equivalent; only the greedy branch (the module's
            # defaults temperature=1.0 / topp<=0) is implemented.
            raise NotImplementedError("top-p sampling branch not implemented")
        # Whole generation runs as one jitted program (single host sync at the end).
        self._jitted = jax.jit(self._generate_impl)

    def generate(self, src_tokens):
        return self._jitted(src_tokens, self.model.embed, self.model.pos,
                            self.model.w_out)

    # ---- jitted implementation ---------------------------------------------
    def _generate_impl(self, src_tokens, embed, pos, w_out):
        bsz, src_len = src_tokens.shape
        beam_size = self.beam_size
        max_len = int(min(self.model.max_decoder_positions(), self.max_len_b or 1e99))
        min_len = min(max_len, self.min_len or 0)
        assert min_len <= max_len

        N = bsz * beam_size
        n_pad = ((N + 7) // 8) * 8            # sublane-aligned row count for the kernel
        start_step = src_len
        num_steps = max_len - start_step

        src_lengths = jnp.sum(
            (src_tokens != self.eos) & (src_tokens != self.pad), axis=1
        ).astype(jnp.int32)

        scores = jnp.zeros((N, max_len), jnp.float32)
        tokens = jnp.full((N, max_len), self.pad, jnp.int32)
        tokens = tokens.at[:, :start_step].set(
            jnp.repeat(src_tokens, beam_size, axis=0))

        # ---- prompt forward pass (Pallas: projection + temperature + log-softmax)
        h = embed[tokens[:, :start_step]] + pos[:start_step][None, :, :]
        lp_prompt = prompt_lprobs(h.reshape(N * start_step, D), w_out, self.temperature)
        lp_prompt = lp_prompt.reshape(N, start_step, V)
        # (reference's -inf writes on model_predictions after get_normalized_probs
        #  are dead code and intentionally omitted)

        if self.need_logprobs:
            all_lprobs = jnp.zeros((N, max_len, V), jnp.float32)
            all_lprobs = all_lprobs.at[:, 1:start_step].set(lp_prompt[:, :-1])

        prompt_tokens = tokens[:, 1:start_step][..., None]
        toscores = jnp.take_along_axis(
            lp_prompt[:, : start_step - 1], prompt_tokens, axis=-1)[..., 0]
        scores = scores.at[:, 1:start_step].set(toscores)

        src_lengths_rep = jnp.repeat(src_lengths, beam_size, axis=0)   # [N]
        col = jnp.arange(max_len)[None, :]
        scores = jnp.where(col >= (src_lengths_rep[:, None] + 1), 0.0, scores)

        lprobs0 = jnp.take_along_axis(
            lp_prompt, src_lengths_rep[:, None, None], axis=1)[:, 0, :]  # [N, V]

        inv_temp = (1.0 / self.temperature) \
            if (self.temperature > 0 and self.temperature != 1.0) else 1.0

        if num_steps > 0:
            lprobs0_p = jnp.pad(lprobs0, ((0, n_pad - N), (0, 0)))
            # algebraic fusion of the two dependent decode matmuls (f32, once)
            table = jnp.dot(embed, w_out)                     # [V, V]
            pos_logits = jnp.dot(pos, w_out)                  # [MAX_POS, V]
            pos_dec = pos_logits[start_step:max_len][:, None, :]   # [num_steps, 1, V]

            fused = make_fused_decode(
                n_pad=n_pad, num_steps=num_steps, n_rows=N, start_step=start_step,
                min_len=min_len, max_len=max_len, pad_id=self.pad, eos_id=self.eos,
                stop_ids=tuple(self.stop), inv_temp=inv_temp,
                need_logprobs=self.need_logprobs)
            outs = fused(lprobs0_p, table, pos_dec)
            tok_slab, score_slab = outs[0], outs[1]
            tokens = tokens.at[:, start_step:max_len].set(tok_slab[:N, :num_steps])
            scores = scores.at[:, start_step:max_len].set(score_slab[:N, :num_steps])
            if self.need_logprobs:
                dist = outs[2]                                # [num_steps, n_pad, V]
                all_lprobs = all_lprobs.at[:, start_step:max_len].set(
                    jnp.transpose(dist, (1, 0, 2))[:N])

        # ---- final beam sort -------------------------------------------------
        beamscores = jnp.cumsum(scores.reshape(bsz, beam_size, -1), axis=-1)[:, :, -1]
        indices = jnp.argsort(-beamscores, axis=-1)
        sorted_indices = (indices + beam_size * jnp.arange(bsz)[:, None]).reshape(-1)
        tokens = tokens[sorted_indices]
        scores = scores[sorted_indices]
        retval = {
            "tokens": tokens.reshape(bsz, beam_size, -1),
            "scores": scores.reshape(bsz, beam_size, -1),
        }
        if self.need_logprobs:
            all_lprobs = all_lprobs[sorted_indices]
            retval["distributions"] = all_lprobs.reshape(bsz, beam_size, -1, V)
        return retval


if __name__ == "__main__":
    key = jax.random.PRNGKey(0)
    kmodel, ktok = jax.random.split(key)
    model = TinyDecoder(kmodel)
    gen = SequenceGeneratorPallas(
        model, beam_size=1, max_len_b=8, min_len=1,
        temperature=1.0, need_logprobs=True, topp=-1)

    bsz, src_len = 2, 4
    body = jax.random.randint(ktok, (bsz, src_len - 1), 4, V, dtype=jnp.int32)
    src_tokens = jnp.concatenate(
        [jnp.full((bsz, 1), EOS, jnp.int32), body], axis=1)   # bos=eos prefix

    out = gen.generate(src_tokens)
    jax.block_until_ready(out["tokens"])
    jax.block_until_ready(out["scores"])
    jax.block_until_ready(out["distributions"])
    print("KERNEL_OK")
</pallas_src>

<mosaic_0001>
module attributes {stable_mosaic.version = 11 : i64} {
  func.func @_prompt_lprobs_kernel(%arg0: i32, %arg1: memref<8x32xf32, #tpu.memory_space<vmem>>, %arg2: memref<32x128xf32, #tpu.memory_space<vmem>>, %arg3: memref<8x128xf32, #tpu.memory_space<vmem>>) attributes {dimension_semantics = [#tpu.dimension_semantics<parallel>], iteration_bounds = array<i64: 1>, scalar_prefetch = 0 : i64, scratch_operands = 0 : i64, tpu.core_type = #tpu.core_type<tc>, window_params = [{transform_indices = @transform_0, window_bounds = array<i64: 8, 32>}, {pipeline_mode = #tpu.pipeline_mode<synchronous>, transform_indices = @transform_1, window_bounds = array<i64: 32, 128>}, {transform_indices = @transform_2, window_bounds = array<i64: 8, 128>}]} {
    %c0 = arith.constant 0 : index
    %c0_0 = arith.constant 0 : index
    %0 = vector.load %arg1[%c0, %c0_0] : memref<8x32xf32, #tpu.memory_space<vmem>>, vector<8x32xf32>
    %c0_1 = arith.constant 0 : index
    %c0_2 = arith.constant 0 : index
    %1 = vector.load %arg2[%c0_1, %c0_2] : memref<32x128xf32, #tpu.memory_space<vmem>>, vector<32x128xf32>
    %cst = arith.constant dense<0.000000e+00> : vector<8x128xf32>
    %2 = tpu.matmul %0, %1, %cst {dimension_numbers = #tpu.dot_dimension_numbers<[1], [0], [0], [1], [0, 0, 1, 1], [], []>} : vector<8x32xf32>, vector<32x128xf32>, vector<8x128xf32> -> vector<8x128xf32>
    %cst_3 = arith.constant dense<0xFF800000> : vector<8xf32>
    %3 = vector.multi_reduction <maximumf>, %2, %cst_3 [1] : vector<8x128xf32> to vector<8xf32>
    %4 = vector.shape_cast %3 : vector<8xf32> to vector<8x1xf32>
    %5 = vector.broadcast %4 : vector<8x1xf32> to vector<8x128xf32>
    %6 = arith.subf %2, %5 : vector<8x128xf32>
    %7 = math.exp %6 : vector<8x128xf32>
    %cst_4 = arith.constant dense<0.000000e+00> : vector<8xf32>
    %8 = vector.multi_reduction <add>, %7, %cst_4 [1] : vector<8x128xf32> to vector<8xf32>
    %9 = vector.shape_cast %8 : vector<8xf32> to vector<8x1xf32>
    %10 = math.log %9 : vector<8x1xf32>
    %11 = arith.addf %10, %4 : vector<8x1xf32>
    %12 = vector.broadcast %11 : vector<8x1xf32> to vector<8x128xf32>
    %13 = arith.subf %2, %12 : vector<8x128xf32>
    %c0_5 = arith.constant 0 : index
    %c0_6 = arith.constant 0 : index
    %14 = vector.load %arg3[%c0_5, %c0_6] : memref<8x128xf32, #tpu.memory_space<vmem>>, vector<8x128xf32>
    tpu.vector_store %arg3[%c0_5, %c0_6], %13 {strides = array<i32>} : memref<8x128xf32, #tpu.memory_space<vmem>>, vector<8x128xf32>,
    return
  }
  func.func @transform_0(%arg0: i32) -> (i32, i32) {
    %c0_i32 = arith.constant 0 : i32
    %c0_i32_0 = arith.constant 0 : i32
    return %arg0, %c0_i32 : i32, i32
  }
  func.func @transform_1(%arg0: i32) -> (i32, i32) {
    %c0_i32 = arith.constant 0 : i32
    %c0_i32_0 = arith.constant 0 : i32
    %c0_i32_1 = arith.constant 0 : i32
    return %c0_i32, %c0_i32_0 : i32, i32
  }
  func.func @transform_2(%arg0: i32) -> (i32, i32) {
    %c0_i32 = arith.constant 0 : i32
    %c0_i32_0 = arith.constant 0 : i32
    return %arg0, %c0_i32 : i32, i32
  }
}

module attributes {stable_mosaic.version = 11 : i64} {
  func.func @_fused_decode_kernel(%arg0: i32, %arg1: memref<8x128xf32, #tpu.memory_space<vmem>>, %arg2: memref<128x128xf32, #tpu.memory_space<vmem>>, %arg3: memref<1x1x128xf32, #tpu.memory_space<vmem>>, %arg4: memref<8x128xi32, #tpu.memory_space<vmem>>, %arg5: memref<8x128xf32, #tpu.memory_space<vmem>>, %arg6: memref<1x8x128xf32, #tpu.memory_space<vmem>>, %arg7: memref<8x128xf32, #tpu.memory_space<vmem>>, %arg8: memref<8x1xf32, #tpu.memory_space<vmem>>, %arg9: memref<8x128xi32, #tpu.memory_space<vmem>>, %arg10: memref<8x128xf32, #tpu.memory_space<vmem>>) attributes {dimension_semantics = [#tpu.dimension_semantics<arbitrary>], iteration_bounds = array<i64: 4>, scalar_prefetch = 0 : i64, scratch_operands = 4 : i64, tpu.core_type = #tpu.core_type<tc>, window_params = [{pipeline_mode = #tpu.pipeline_mode<synchronous>, transform_indices = @transform_0, window_bounds = array<i64: 8, 128>}, {pipeline_mode = #tpu.pipeline_mode<synchronous>, transform_indices = @transform_1, window_bounds = array<i64: 128, 128>}, {transform_indices = @transform_2, window_bounds = array<i64: 1, 1, 128>}, {pipeline_mode = #tpu.pipeline_mode<synchronous>, transform_indices = @transform_3, window_bounds = array<i64: 8, 128>}, {pipeline_mode = #tpu.pipeline_mode<synchronous>, transform_indices = @transform_4, window_bounds = array<i64: 8, 128>}, {transform_indices = @transform_5, window_bounds = array<i64: 1, 8, 128>}]} {
    %c4_i32 = arith.constant 4 : i32
    %0 = arith.addi %arg0, %c4_i32 : i32
    %c0_i32 = arith.constant 0 : i32
    %1 = arith.cmpi eq, %arg0, %c0_i32 : i32
    %2 = arith.extui %1 : i1 to i32
    %c0_i32_0 = arith.constant 0 : i32
    %3 = arith.cmpi ne, %2, %c0_i32_0 : i32
    scf.if %3 {
      %c0_39 = arith.constant 0 : index
      %c0_40 = arith.constant 0 : index
      %93 = vector.load %arg1[%c0_39, %c0_40] : memref<8x128xf32, #tpu.memory_space<vmem>>, vector<8x128xf32>
      %c0_41 = arith.constant 0 : index
      %c0_42 = arith.constant 0 : index
      %94 = vector.load %arg7[%c0_41, %c0_42] : memref<8x128xf32, #tpu.memory_space<vmem>>, vector<8x128xf32>
      tpu.vector_store %arg7[%c0_41, %c0_42], %93 {strides = array<i32>} : memref<8x128xf32, #tpu.memory_space<vmem>>, vector<8x128xf32>,
      %95 = tpu.iota {dimensions = array<i32: 0>} : vector<8x1xi32>
      %c2_i32_43 = arith.constant 2 : i32
      %96 = vector.broadcast %c2_i32_43 : i32 to vector<8x1xi32>
      %97 = arith.cmpi sge, %95, %96 : vector<8x1xi32>
      %98 = arith.extui %97 : vector<8x1xi1> to vector<8x1xi32>
      %99 = arith.sitofp %98 : vector<8x1xi32> to vector<8x1xf32>
      %c0_44 = arith.constant 0 : index
      %c0_45 = arith.constant 0 : index
      %100 = vector.load %arg8[%c0_44, %c0_45] : memref<8x1xf32, #tpu.memory_space<vmem>>, vector<8x1xf32>
      tpu.vector_store %arg8[%c0_44, %c0_45], %99 {strides = array<i32>} : memref<8x1xf32, #tpu.memory_space<vmem>>, vector<8x1xf32>,
      %c1_i32_46 = arith.constant 1 : i32
      %101 = vector.broadcast %c1_i32_46 : i32 to vector<8x128xi32>
      %c0_47 = arith.constant 0 : index
      %c0_48 = arith.constant 0 : index
      %102 = vector.load %arg9[%c0_47, %c0_48] : memref<8x128xi32, #tpu.memory_space<vmem>>, vector<8x128xi32>
      tpu.vector_store %arg9[%c0_47, %c0_48], %101 {strides = array<i32>} : memref<8x128xi32, #tpu.memory_space<vmem>>, vector<8x128xi32>,
      %cst_49 = arith.constant 0.000000e+00 : f32
      %103 = vector.broadcast %cst_49 : f32 to vector<8x128xf32>
      %c0_50 = arith.constant 0 : index
      %c0_51 = arith.constant 0 : index
      %104 = vector.load %arg10[%c0_50, %c0_51] : memref<8x128xf32, #tpu.memory_space<vmem>>, vector<8x128xf32>
      tpu.vector_store %arg10[%c0_50, %c0_51], %103 {strides = array<i32>} : memref<8x128xf32, #tpu.memory_space<vmem>>, vector<8x128xf32>,
    } else {
    }
    %c0 = arith.constant 0 : index
    %c0_1 = arith.constant 0 : index
    %4 = vector.load %arg7[%c0, %c0_1] : memref<8x128xf32, #tpu.memory_space<vmem>>, vector<8x128xf32>
    %c0_2 = arith.constant 0 : index
    %c0_3 = arith.constant 0 : index
    %5 = vector.load %arg8[%c0_2, %c0_3] : memref<8x1xf32, #tpu.memory_space<vmem>>, vector<8x1xf32>
    %cst = arith.constant 5.000000e-01 : f32
    %6 = vector.broadcast %cst : f32 to vector<8x1xf32>
    %7 = arith.cmpf ogt, %5, %6 : vector<8x1xf32>
    %cst_4 = arith.constant dense<0x7F800000> : vector<1xf32>
    %8 = vector.multi_reduction <minimumf>, %5, %cst_4 [0] : vector<8x1xf32> to vector<1xf32>
    %9 = vector.shape_cast %8 : vector<1xf32> to vector<1x1xf32>
    %cst_5 = arith.constant 5.000000e-01 : f32
    %10 = vector.broadcast %cst_5 : f32 to vector<1x1xf32>
    %11 = arith.cmpf olt, %9, %10 : vector<1x1xf32>
    %12 = tpu.iota {dimensions = array<i32: 1>} : vector<8x128xi32>
    %13 = arith.cmpf one, %4, %4 : vector<8x128xf32>
    %cst_6 = arith.constant 0xFF800000 : f32
    %14 = vector.broadcast %cst_6 : f32 to vector<8x128xf32>
    %15 = arith.select %13, %14, %4 : vector<8x128xi1>, vector<8x128xf32>
    %c1_i32 = arith.constant 1 : i32
    %16 = vector.broadcast %c1_i32 : i32 to vector<8x128xi32>
    %17 = arith.cmpi eq, %12, %16 : vector<8x128xi32>
    %cst_7 = arith.constant 0xFF800000 : f32
    %18 = vector.broadcast %cst_7 : f32 to vector<8x128xf32>
    %19 = arith.select %17, %18, %15 : vector<8x128xi1>, vector<8x128xf32>
    %c2_i32 = arith.constant 2 : i32
    %20 = vector.broadcast %c2_i32 : i32 to vector<8x128xi32>
    %21 = arith.cmpi ne, %12, %20 : vector<8x128xi32>
    %c7_i32 = arith.constant 7 : i32
    %22 = arith.cmpi sge, %0, %c7_i32 : i32
    %23 = vector.broadcast %22 : i1 to vector<8x128xi1>
    %24 = arith.andi %23, %21 : vector<8x128xi1>
    %cst_8 = arith.constant 0xFF800000 : f32
    %25 = vector.broadcast %cst_8 : f32 to vector<8x128xf32>
    %26 = arith.select %24, %25, %19 : vector<8x128xi1>, vector<8x128xf32>
    %27 = vector.broadcast %7 : vector<8x1xi1> to vector<8x128xi1>
    %28 = arith.andi %27, %21 : vector<8x128xi1>
    %cst_9 = arith.constant 0xFF800000 : f32
    %29 = vector.broadcast %cst_9 : f32 to vector<8x128xf32>
    %30 = arith.select %28, %29, %26 : vector<8x128xi1>, vector<8x128xf32>
    %cst_10 = arith.constant dense<0xFF800000> : vector<8xf32>
    %31 = vector.multi_reduction <maximumf>, %30, %cst_10 [1] : vector<8x128xf32> to vector<8xf32>
    %32 = vector.shape_cast %31 : vector<8xf32> to vector<8x1xf32>
    %33 = vector.broadcast %32 : vector<8x1xf32> to vector<8x128xf32>
    %34 = arith.cmpf oeq, %30, %33 : vector<8x128xf32>
    %35 = arith.sitofp %12 : vector<8x128xi32> to vector<8x128xf32>
    %cst_11 = arith.constant 1.280000e+02 : f32
    %36 = vector.broadcast %cst_11 : f32 to vector<8x128xf32>
    %37 = arith.select %34, %35, %36 : vector<8x128xi1>, vector<8x128xf32>
    %cst_12 = arith.constant dense<0x7F800000> : vector<8xf32>
    %38 = vector.multi_reduction <minimumf>, %37, %cst_12 [1] : vector<8x128xf32> to vector<8xf32>
    %39 = vector.shape_cast %38 : vector<8xf32> to vector<8x1xf32>
    %40 = arith.fptosi %39 : vector<8x1xf32> to vector<8x1xi32>
    %41 = tpu.iota {dimensions = array<i32: 1>} : vector<8x128xi32>
    %42 = vector.broadcast %arg0 : i32 to vector<8x128xi32>
    %43 = arith.cmpi eq, %41, %42 : vector<8x128xi32>
    %44 = vector.broadcast %11 : vector<1x1xi1> to vector<8x128xi1>
    %45 = arith.andi %43, %44 : vector<8x128xi1>
    %46 = vector.shape_cast %40 : vector<8x1xi32> to vector<8x1xi32>
    %47 = vector.broadcast %46 : vector<8x1xi32> to vector<8x128xi32>
    %c0_13 = arith.constant 0 : index
    %c0_14 = arith.constant 0 : index
    %48 = vector.load %arg9[%c0_13, %c0_14] : memref<8x128xi32, #tpu.memory_space<vmem>>, vector<8x128xi32>
    %49 = arith.select %45, %47, %48 : vector<8x128xi1>, vector<8x128xi32>
    %c0_15 = arith.constant 0 : index
    %c0_16 = arith.constant 0 : index
    %50 = vector.load %arg9[%c0_15, %c0_16] : memref<8x128xi32, #tpu.memory_space<vmem>>, vector<8x128xi32>
    tpu.vector_store %arg9[%c0_15, %c0_16], %49 {strides = array<i32>} : memref<8x128xi32, #tpu.memory_space<vmem>>, vector<8x128xi32>,
    %51 = vector.shape_cast %32 : vector<8x1xf32> to vector<8x1xf32>
    %52 = vector.broadcast %51 : vector<8x1xf32> to vector<8x128xf32>
    %c0_17 = arith.constant 0 : index
    %c0_18 = arith.constant 0 : index
    %53 = vector.load %arg10[%c0_17, %c0_18] : memref<8x128xf32, #tpu.memory_space<vmem>>, vector<8x128xf32>
    %54 = arith.select %45, %52, %53 : vector<8x128xi1>, vector<8x128xf32>
    %c0_19 = arith.constant 0 : index
    %c0_20 = arith.constant 0 : index
    %55 = vector.load %arg10[%c0_19, %c0_20] : memref<8x128xf32, #tpu.memory_space<vmem>>, vector<8x128xf32>
    tpu.vector_store %arg10[%c0_19, %c0_20], %54 {strides = array<i32>} : memref<8x128xf32, #tpu.memory_space<vmem>>, vector<8x128xf32>,
    %cst_21 = arith.constant 0.000000e+00 : f32
    %56 = vector.shape_cast %11 : vector<1x1xi1> to vector<1x1xi1>
    %57 = vector.broadcast %56 : vector<1x1xi1> to vector<8x128xi1>
    %58 = vector.broadcast %cst_21 : f32 to vector<8x128xf32>
    %59 = arith.select %57, %30, %58 : vector<8x128xi1>, vector<8x128xf32>
    %60 = vector.shape_cast %59 : vector<8x128xf32> to vector<1x8x128xf32>
    %c0_22 = arith.constant 0 : index
    %c0_23 = arith.constant 0 : index
    %c0_24 = arith.constant 0 : index
    %61 = vector.load %arg6[%c0_22, %c0_23, %c0_24] : memref<1x8x128xf32, #tpu.memory_space<vmem>>, vector<1x8x128xf32>
    tpu.vector_store %arg6[%c0_22, %c0_23, %c0_24], %60 {strides = array<i32>} : memref<1x8x128xf32, #tpu.memory_space<vmem>>, vector<1x8x128xf32>,
    %c2_i32_25 = arith.constant 2 : i32
    %62 = vector.broadcast %c2_i32_25 : i32 to vector<8x1xi32>
    %63 = arith.cmpi eq, %40, %62 : vector<8x1xi32>
    %64 = arith.extui %63 : vector<8x1xi1> to vector<8x1xi32>
    %65 = arith.sitofp %64 : vector<8x1xi32> to vector<8x1xf32>
    %66 = arith.maximumf %5, %65 : vector<8x1xf32>
    %c0_26 = arith.constant 0 : index
    %c0_27 = arith.constant 0 : index
    %67 = vector.load %arg8[%c0_26, %c0_27] : memref<8x1xf32, #tpu.memory_space<vmem>>, vector<8x1xf32>
    tpu.vector_store %arg8[%c0_26, %c0_27], %66 {strides = array<i32>} : memref<8x1xf32, #tpu.memory_space<vmem>>, vector<8x1xf32>,
    %68 = vector.broadcast %40 : vector<8x1xi32> to vector<8x128xi32>
    %69 = arith.cmpi eq, %12, %68 : vector<8x128xi32>
    %70 = arith.extui %69 : vector<8x128xi1> to vector<8x128xi32>
    %71 = arith.sitofp %70 : vector<8x128xi32> to vector<8x128xf32>
    %c0_28 = arith.constant 0 : index
    %c0_29 = arith.constant 0 : index
    %72 = vector.load %arg2[%c0_28, %c0_29] : memref<128x128xf32, #tpu.memory_space<vmem>>, vector<128x128xf32>
    %cst_30 = arith.constant dense<0.000000e+00> : vector<8x128xf32>
    %73 = tpu.matmul %71, %72, %cst_30 {dimension_numbers = #tpu.dot_dimension_numbers<[1], [0], [0], [1], [0, 0, 1, 1], [], []>} : vector<8x128xf32>, vector<128x128xf32>, vector<8x128xf32> -> vector<8x128xf32>
    %c0_31 = arith.constant 0 : index
    %c0_32 = arith.constant 0 : index
    %c0_33 = arith.constant 0 : index
    %74 = vector.load %arg3[%c0_31, %c0_32, %c0_33] : memref<1x1x128xf32, #tpu.memory_space<vmem>>, vector<1x1x128xf32>
    %75 = vector.shape_cast %74 : vector<1x1x128xf32> to vector<1x128xf32>
    %76 = vector.broadcast %75 : vector<1x128xf32> to vector<8x128xf32>
    %77 = arith.addf %73, %76 : vector<8x128xf32>
    %cst_34 = arith.constant dense<0xFF800000> : vector<8xf32>
    %78 = vector.multi_reduction <maximumf>, %77, %cst_34 [1] : vector<8x128xf32> to vector<8xf32>
    %79 = vector.shape_cast %78 : vector<8xf32> to vector<8x1xf32>
    %80 = vector.broadcast %79 : vector<8x1xf32> to vector<8x128xf32>
    %81 = arith.subf %77, %80 : vector<8x128xf32>
    %82 = math.exp %81 : vector<8x128xf32>
    %cst_35 = arith.constant dense<0.000000e+00> : vector<8xf32>
    %83 = vector.multi_reduction <add>, %82, %cst_35 [1] : vector<8x128xf32> to vector<8xf32>
    %84 = vector.shape_cast %83 : vector<8xf32> to vector<8x1xf32>
    %85 = math.log %84 : vector<8x1xf32>
    %86 = arith.addf %85, %79 : vector<8x1xf32>
    %87 = vector.broadcast %86 : vector<8x1xf32> to vector<8x128xf32>
    %88 = arith.subf %77, %87 : vector<8x128xf32>
    %c0_36 = arith.constant 0 : index
    %c0_37 = arith.constant 0 : index
    %89 = vector.load %arg7[%c0_36, %c0_37] : memref<8x128xf32, #tpu.memory_space<vmem>>, vector<8x128xf32>
    tpu.vector_store %arg7[%c0_36, %c0_37], %88 {strides = array<i32>} : memref<8x128xf32, #tpu.memory_space<vmem>>, vector<8x128xf32>,
    %c3_i32 = arith.constant 3 : i32
    %90 = arith.cmpi eq, %arg0, %c3_i32 : i32
    %91 = arith.extui %90 : i1 to i32
    %c0_i32_38 = arith.constant 0 : i32
    %92 = arith.cmpi ne, %91, %c0_i32_38 : i32
    scf.if %92 {
      %c0_39 = arith.constant 0 : index
      %c0_40 = arith.constant 0 : index
      %93 = vector.load %arg9[%c0_39, %c0_40] : memref<8x128xi32, #tpu.memory_space<vmem>>, vector<8x128xi32>
      %c0_41 = arith.constant 0 : index
      %c0_42 = arith.constant 0 : index
      %94 = vector.load %arg4[%c0_41, %c0_42] : memref<8x128xi32, #tpu.memory_space<vmem>>, vector<8x128xi32>
      tpu.vector_store %arg4[%c0_41, %c0_42], %93 {strides = array<i32>} : memref<8x128xi32, #tpu.memory_space<vmem>>, vector<8x128xi32>,
      %c0_43 = arith.constant 0 : index
      %c0_44 = arith.constant 0 : index
      %95 = vector.load %arg10[%c0_43, %c0_44] : memref<8x128xf32, #tpu.memory_space<vmem>>, vector<8x128xf32>
      %c0_45 = arith.constant 0 : index
      %c0_46 = arith.constant 0 : index
      %96 = vector.load %arg5[%c0_45, %c0_46] : memref<8x128xf32, #tpu.memory_space<vmem>>, vector<8x128xf32>
      tpu.vector_store %arg5[%c0_45, %c0_46], %95 {strides = array<i32>} : memref<8x128xf32, #tpu.memory_space<vmem>>, vector<8x128xf32>,
    } else {
    }
    return
  }
  func.func @transform_0(%arg0: i32) -> (i32, i32) {
    %c0_i32 = arith.constant 0 : i32
    %c0_i32_0 = arith.constant 0 : i32
    %c0_i32_1 = arith.constant 0 : i32
    return %c0_i32, %c0_i32_0 : i32, i32
  }
  func.func @transform_1(%arg0: i32) -> (i32, i32) {
    %c0_i32 = arith.constant 0 : i32
    %c0_i32_0 = arith.constant 0 : i32
    %c0_i32_1 = arith.constant 0 : i32
    return %c0_i32, %c0_i32_0 : i32, i32
  }
  func.func @transform_2(%arg0: i32) -> (i32, i32, i32) {
    %c0_i32 = arith.constant 0 : i32
    %c0_i32_0 = arith.constant 0 : i32
    %c0_i32_1 = arith.constant 0 : i32
    return %arg0, %c0_i32, %c0_i32_0 : i32, i32, i32
  }
  func.func @transform_3(%arg0: i32) -> (i32, i32) {
    %c0_i32 = arith.constant 0 : i32
    %c0_i32_0 = arith.constant 0 : i32
    %c0_i32_1 = arith.constant 0 : i32
    return %c0_i32, %c0_i32_0 : i32, i32
  }
  func.func @transform_4(%arg0: i32) -> (i32, i32) {
    %c0_i32 = arith.constant 0 : i32
    %c0_i32_0 = arith.constant 0 : i32
    %c0_i32_1 = arith.constant 0 : i32
    return %c0_i32, %c0_i32_0 : i32, i32
  }
  func.func @transform_5(%arg0: i32) -> (i32, i32, i32) {
    %c0_i32 = arith.constant 0 : i32
    %c0_i32_0 = arith.constant 0 : i32
    %c0_i32_1 = arith.constant 0 : i32
    return %arg0, %c0_i32, %c0_i32_0 : i32, i32, i32
  }
}

</mosaic_0001>

<bundles_post_ra>
// kernel: _generate_impl.2
= control target key start
LH: loop header
LB: loop body
LE: loop exit
PB: predicated region body
PF: predicated region fallthrough
CT: control target
= control target key end

     0   :  { %vm16_vm0 = vcmask 261120   ;;  %s94_s1 = inlined_call_operand.vmem [shape: f32[32,128], index: 1, kind: input, shape index: {}]   ;;  %s95_s0 = inlined_call_operand.vmem [shape: f32[8,32], index: 0, kind: input, shape index: {}]   ;;  %s96_s2 = inlined_call_operand.vmem [shape: f32[8,128], index: 2, kind: output, shape index: {}]  }
   0x1   :  { %v15_v0 = vld [vmem:[%s94_s1 + $0x18] sm:$0xff]  ;;  %v14_v1 = vld [vmem:[%s94_s1 + $0x10] sm:$0xff]  ;;  %v13_v2 = vld [vmem:[%s94_s1 + $0x8] sm:$0xff] }
   0x2   :  { %32 = vmatpush.msra.mxu0 %v15_v0  ;;  %v12_v3 = vld [vmem:[%s94_s1] sm:$0xff] }
   0x3   :  { %v11_v4 = vld [vmem:[%s95_s0] sm:$0xff] }
   0x4   :  { %33 = vmatpush.msra.mxu0 %v14_v1 }
   0x6   :  { %34 = vmatpush.msra.mxu0 %v13_v2 }
   0x8   :  { %35 = vmatpush.msra.mxu0 %v12_v3 }
   0x9   :  { %56 = vmatmul.msk.f32.vlgmr.msra.gmra.mxu0 %vm16_vm0, %v11_v4 }
  0x86   :  { %v37_v5 = vpop.f32.mrf.mxu0 }
  0x87   :  { %40 = vmax.xlane.f32.xlu0 %v37_v5 }
  0xfa   :  { %v41_v6 = vpop.xlane.xlu0 %40 }
  0xfb   :  { %v42_v7 = vsub.f32 %v37_v5, %v41_v6 }
  0xfd   :  { %v43_v8 = vmul.f32 1.442695, %v42_v7 }
  0xff   :  { %57 = vpow2.f32 %v43_v8 }
 0x105   :  { %v58_v9 = vpop.eup %57 }
 0x106   :  { %45 = vadd.xlane.f32.xlu0 %v58_v9 }
 0x179   :  { %v46_v10 = vpop.xlane.xlu0 %45 }
 0x17a   :  { %59 = vlog2.f32 %v46_v10 }
 0x180   :  { %v60_v11 = vpop.eup %59 }
 0x181   :  { %v48_v12 = vmul.f32 0.6931472, %v60_v11 }
 0x183   :  { %v49_v13 = vadd.f32 %v48_v12, %v41_v6 }
 0x185   :  { %v50_v14 = vsub.f32 %v37_v5, %v49_v13 }
 0x187   :  { %51 = vst [vmem:[%s96_s2] sm:$0xff] %v50_v14 }

// kernel: _generate_impl.3
= control target key start
LH: loop header
LB: loop body
LE: loop exit
PB: predicated region body
PF: predicated region fallthrough
CT: control target
= control target key end

     0   :  { %s496_s18 = smov 0   ;;  %s615_s0 = inlined_call_operand.vmem [shape: f32[8,128], index: 0, kind: input, shape index: {}]   ;;  %s616_s1 = inlined_call_operand.vmem [shape: f32[128,128], index: 1, kind: input, shape index: {}]   ;;  %s617_s2 = inlined_call_operand.vmem [shape: f32[4,1,128], index: 2, kind: input, shape index: {}]   ;;  %s618_s3 = inlined_call_operand.vmem [shape: s32[8,128], index: 3, kind: output, shape index: {0}]   ;;  %s619_s4 = inlined_call_operand.vmem [shape: f32[8,128], index: 4, kind: output, shape index: {1}]   ;;  %s620_s5 = inlined_call_operand.vmem [shape: f32[4,8,128], index: 5, kind: output, shape index: {2}]  }
   0x1 LB: > { %s502_s19 = sadd.s32 4294967295, %s459_s18   ;;  %p418_p0 = scmp.ge.s32.totalorder %s459_s18, 1  ;;  %s459_s18 = sphi %s496_s18, %s16_s18  }
   0x2   : > { %p180_p1 = scmp.lt.s32.totalorder %s459_s18, 5 }
   0x4   : > { %p181_p2 = pnand %p418_p0, %p180_p1 }
   0x5   : > { %p205_p3 = scmp.lt.s32.totalorder (!%p181_p2), %s502_s19, 3  ;;  %s212_s20 = sadd.s32 (!%p181_p2), 4, %s502_s19 }
   0x6   : > { %184 = sbr.rel (%p181_p2) target bundleno = 783 (0x30f), region = 32  ;;  %p420_p4 = scmp.ne.s32.totalorder (!%p181_p2), %s502_s19, 0 }
   0xb   : > { %s509_s21 = scalar_select %p205_p3, %s502_s19, 3 }
   0xc   : > { %216 = sbr.rel (%p420_p4) target bundleno = 24 (0x18), region = 36 }
   0xd   : > { %s207_s24 = scalar_lea.vmem %s617_s2, %s509_s21  ;;  %s419_s25 = sshll.u32 %s509_s21, 3 }
   0xe   : > { %s519_s28 = scalar_lea.vmem %s620_s5, %s419_s25 }
  0x11   : > { %v217_v0 = vld [vmem:[%s615_s0] sm:$0xff]  ;;  %v219_v1 = vlaneseq  ;;  %v461_v3 = vmov 0.0   ;;  %vm224_vm0 = vcmask 7168   ;;  %v462_v4 = vmov 1  }
  0x12   : > { %218 = vst [vmem:[#allocation2] sm:$0xff] %v217_v0 }
  0x13   : > { %v220_v2 = vshrl.u32 %v219_v1, 7  ;;  %227 = vst [vmem:[#allocation5] sm:$0xff] %v461_v3 }
  0x14   : > { %226 = vst [vmem:[#allocation4] sm:$0xff] %v462_v4 }
  0x15   : > { %vm221_vm1 = vcmp.ge.s32.totalorder %v220_v2, 2 }
  0x16   : > { %v421_v5 = vsel %vm221_vm1, 1.0, %v461_v3 }
  0x17   : > { %225 = vst.msk [vmem:[#allocation3] sm:$0xff] %vm224_vm0, %v421_v5 }
  0x18 PF: > { %v463_v7 = vmov 0   ;;  %p247_p5 = scmp.ge.s32.totalorder %s212_s20, 7  ;;  %v240_v9 = vlaneseq  ;;  %v307_v18 = vld [vmem:[%s616_s1 + $0x78] sm:$0xff]  ;;  %v306_v19 = vld [vmem:[%s616_s1 + $0x70] sm:$0xff]  ;;  %v305_v20 = vld [vmem:[%s616_s1 + $0x68] sm:$0xff]  ;;  %v464_v42 = vmov 0.0   ;;  %v268_v62 = vstv %s502_s19 }
  0x19   : > { %446 = vset.pattern.permute.xlu0 %v463_v7  ;;  %447 = vset.pattern.permute.xlu2 %v463_v7  ;;  %v228_v10 = vld [vmem:[#allocation2] sm:$0xff]  ;;  %v303_v22 = vld [vmem:[%s616_s1 + $0x58] sm:$0xff]  ;;  %v302_v23 = vld [vmem:[%s616_s1 + $0x50] sm:$0xff]  ;;  %v465_v44 = vmov 1.0   ;;  %vm231_vm14 = vcmask 7168   ;;  %p425_p6 = scmp.ne.s32.totalorder %s502_s19, 3 }
  0x1a   : > { %s248_s6 = scalar_select %p247_p5, 1, 0  ;;  %v531_v11 = vand.u32 127, %v240_v9  ;;  %vm242_vm3 = vcmp.ne.f32.partialorder %v228_v10, %v228_v10  ;;  %312 = vmatpush.msra.mxu0 %v307_v18  ;;  %v304_v21 = vld [vmem:[%s616_s1 + $0x60] sm:$0xff]  ;;  %v301_v24 = vld [vmem:[%s616_s1 + $0x48] sm:$0xff]  ;;  %v299_v26 = vld [vmem:[%s616_s1 + $0x38] sm:$0xff] }
  0x1b   : > { %v243_v13 = vsel %vm242_vm3, -inf, %v228_v10  ;;  %v300_v25 = vld [vmem:[%s616_s1 + $0x40] sm:$0xff]  ;;  %v298_v27 = vld [vmem:[%s616_s1 + $0x30] sm:$0xff]  ;;  %v297_v28 = vld [vmem:[%s616_s1 + $0x28] sm:$0xff] }
  0x1c   : > { %v249_v12 = vstv %s248_s6  ;;  %vm246_vm4 = vcmp.ne.s32.totalorder %v531_v11, 2  ;;  %vm244_vm6 = vcmp.eq.s32.totalorder %v531_v11, 1  ;;  %313 = vmatpush.msra.mxu0 %v306_v19  ;;  %v296_v29 = vld [vmem:[%s616_s1 + $0x20] sm:$0xff]  ;;  %v295_v30 = vld [vmem:[%s616_s1 + $0x18] sm:$0xff]  ;;  %v263_v31 = vcvt.s32.f32 %v531_v11  ;;  %v294_v34 = vld [vmem:[%s616_s1 + $0x10] sm:$0xff] }
  0x1d   : > { %vm250_vm5 = vcmp.eq.s32.totalorder %v249_v12, 1  ;;  %v245_v14 = vsel %vm244_vm6, -inf, %v243_v13  ;;  %v293_v35 = vld [vmem:[%s616_s1 + $0x8] sm:$0xff]  ;;  %v292_v36 = vld [vmem:[%s616_s1] sm:$0xff]  ;;  %vm269_vm0 = vcmp.eq.s32.totalorder %v531_v11, %v268_v62  ;;  %v276_v1 = vld [vmem:[#allocation4] sm:$0xff] }
  0x1e   : > { %v525_v6 = vld [vmem:[#allocation3] sm:$0xff]  ;;  %vm251_vm7 = vmand %vm250_vm5, %vm246_vm4  ;;  %314 = vmatpush.msra.mxu0 %v305_v20  ;;  %v448_v46 = vld [vmem:[%s207_s24] ss:$0 sm:$0xff] }
  0x1f   : > { %vm230_vm2 = vcmp.gt.f32.partialorder %v525_v6, 0.5  ;;  %v252_v16 = vsel %vm251_vm7, -inf, %v245_v14  ;;  %v232_v52 = vsel %vm231_vm14, %v525_v6, inf  ;;  %v279_v2 = vld [vmem:[#allocation5] sm:$0xff] }
  0x20   : > { %v253_v8 = vsel %vm230_vm2, 1, %v463_v7  ;;  %315 = vmatpush.msra.mxu0 %v304_v21  ;;  %v233_v53 = vrot.slane %v232_v52, 4 }
  0x21   : > { %255 = vperm.xlu0 %446, %v253_v8  }
  0x22   : > { %316 = vmatpush.msra.mxu0 %v303_v22  ;;  %v234_v54 = vmin.f32 %v232_v52, %v233_v53 }
  0x24   : > { %317 = vmatpush.msra.mxu0 %v302_v23  ;;  %v235_v56 = vrot.slane %v234_v54, 2 }
  0x26   : > { %318 = vmatpush.msra.mxu0 %v301_v24  ;;  %v236_v57 = vmin.f32 %v234_v54, %v235_v56 }
  0x28   : > { %319 = vmatpush.msra.mxu0 %v300_v25  ;;  %v237_v58 = vrot.slane %v236_v57, 1 }
  0x2a   : > { %320 = vmatpush.msra.mxu0 %v299_v26  ;;  %v238_v59 = vmin.f32 %v236_v57, %v237_v58 }
  0x2c   : > { %321 = vmatpush.msra.mxu0 %v298_v27  ;;  %vm239_vm15 = vcmp.lt.f32.partialorder %v238_v59, 0.5 }
  0x2d   : > { %v270_v60 = vsel %vm239_vm15, 1, %v463_v7 }
  0x2e   : > { %322 = vmatpush.msra.mxu0 %v297_v28 }
  0x30   : > { %323 = vmatpush.msra.mxu0 %v296_v29 }
  0x32   : > { %324 = vmatpush.msra.mxu0 %v295_v30 }
  0x34   : > { %325 = vmatpush.msra.mxu0 %v294_v34 }
  0x36   : > { %326 = vmatpush.msra.mxu0 %v293_v35 }
  0x38   : > { %327 = vmatpush.msra.mxu0 %v292_v36 }
  0x93   : > { %v256_v15 = vpop.permute.xlu0 %255 }
  0x94   : > { %vm257_vm8 = vcmp.eq.s32.totalorder %v256_v15, 1 }
  0x95   : > { %vm258_vm9 = vmand %vm257_vm8, %vm246_vm4 }
  0x96   : > { %v535_v17 = vsel %vm258_vm9, -inf, %v252_v16 }
  0x97   : > { %260 = vmax.xlane.f32.xlu0 %v535_v17 }
 0x10a   : > { %v578_v32 = vpop.xlane.xlu0 %260 }
 0x10b   : > { %vm262_vm10 = vcmp.eq.f32.partialorder %v535_v17, %v578_v32 }
 0x10c   : > { %v264_v33 = vsel %vm262_vm10, %v263_v31, 128.0 }
 0x10d   : > { %265 = vmin.xlane.f32.xlu1 %v264_v33 }
 0x180   : > { %v266_v37 = vpop.xlane.xlu1 %265 }
 0x181   : > { %vm428_vm11 = vcmp.lt.s32.totalorder %v266_v37, 0  ;;  %v429_v38 = vceil.f32 %v266_v37  ;;  %v430_v39 = vfloor.f32 %v266_v37 }
 0x183   : > { %v431_v40 = vsel %vm428_vm11, %v429_v38, %v430_v39 }
 0x184   : > { %v432_v41 = vcvt.f32.s32 %v431_v40 }
 0x186   : > { %vm284_vm12 = vcmp.eq.s32.totalorder %v432_v41, 2  ;;  %vm289_vm13 = vcmp.eq.s32.totalorder %v531_v11, %v432_v41 }
 0x187   : > { %v422_v43 = vsel %vm284_vm12, 1.0, %v464_v42  ;;  %424 = vmatmul.msk.f32.vlgmr.msra.gmra.mxu0 %vm289_vm13, %v465_v44 }
 0x188   : > { %v287_v45 = vmax.f32 %v525_v6, %v422_v43 }
 0x18a   : > { %288 = vst.msk [vmem:[#allocation3] sm:$0xff] %vm231_vm14, %v287_v45 }
 0x204   : > { %v329_v47 = vpop.f32.mrf.mxu0 }
 0x205   : > { %v330_v48 = vadd.f32 %v448_v46, %v329_v47 }
 0x207   : > { %332 = vmax.xlane.f32.xlu1 %v330_v48 }
 0x27a   : > { %v333_v49 = vpop.xlane.xlu1 %332 }
 0x27b   : > { %v334_v50 = vsub.f32 %v330_v48, %v333_v49 }
 0x27d   : > { %v335_v51 = vmul.f32 1.442695, %v334_v50 }
 0x27f   : > { %449 = vpow2.f32 %v335_v51 }
 0x285   : > { %v450_v55 = vpop.eup %449 }
 0x286   : > { %337 = vadd.xlane.f32.xlu2 %v450_v55 }
 0x29e   : > { %272 = vperm.xlu2 %447, %v270_v60  }
 0x2f9   : > { %v338_v61 = vpop.xlane.xlu2 %337 }
 0x2fa   : > { %451 = vlog2.f32 %v338_v61 }
 0x300   : > { %v452_v63 = vpop.eup %451 }
 0x301   : > { %v340_v0 = vmul.f32 0.6931472, %v452_v63  ;;  %v273_v3 = vpop.permute.xlu2 %272 }
 0x302   : > { %vm274_vm1 = vcmp.eq.s32.totalorder %v273_v3, 1 }
 0x303   : > { %v341_v4 = vadd.f32 %v340_v0, %v333_v49  ;;  %vm275_vm2 = vmand %vm269_vm0, %vm274_vm1  ;;  %v282_v5 = vsel %vm274_vm1, %v535_v17, 0.0  ;;  %347 = sbr.rel (%p425_p6) target bundleno = 783 (0x30f), region = 40 }
 0x304   : > { %v277_v6 = vsel %vm275_vm2, %v432_v41, %v276_v1  ;;  %v280_v7 = vsel %vm275_vm2, %v578_v32, %v279_v2  ;;  %283 = vst [vmem:[%s519_s28] sm:$0xff] %v282_v5 }
 0x305   : > { %v342_v8 = vsub.f32 %v330_v48, %v341_v4  ;;  %278 = vst [vmem:[#allocation4] sm:$0xff] %v277_v6 }
 0x306   : > { %281 = vst [vmem:[#allocation5] sm:$0xff] %v280_v7 }
 0x307   : > { %343 = vst [vmem:[#allocation2] sm:$0xff] %v342_v8 }
 0x30c   : > { %v348_v9 = vld [vmem:[#allocation4] sm:$0xff] }
 0x30d   : > { %v350_v10 = vld [vmem:[#allocation5] sm:$0xff]  ;;  %349 = vst [vmem:[%s618_s3] sm:$0xff] %v348_v9 }
 0x30e   : > { %351 = vst [vmem:[%s619_s4] sm:$0xff] %v350_v10 }
 0x30f PF: > { %s16_s18 = sadd.s32 1, %s459_s18  }
 0x310   : > { %p13_p7 = scmp.ge.s32.totalorder %s16_s18, 6  }
 0x312   :  { %15 = sbr.rel (!%p13_p7) target bundleno = 1 (0x1), region = 86 }

</bundles_post_ra>
